<compile_context>
chip_gen: v7x
topology: tpu7x:2x2x1
jax: 0.10.0
libtpu: 0.0.40
codegen_flags: <defaults>
</compile_context>

<pallas_src>
import jax
import jax.numpy as jnp
from jax.experimental import pallas as pl
from jax.experimental.pallas import tpu as pltpu


def simple_nn_kernel(x_ref, w1_ref, b1w2_ref, b2_ref, o_ref):
    # x_ref:    (TILE_B, D)  VMEM  batch tile, features on the lane axis
    # w1_ref:   (D, H)       VMEM  resident across the whole grid
    # b1w2_ref: (2, H)       VMEM  row 0 = b1, row 1 = w2 (stored as a row), resident
    # b2_ref:   (1, 1)       SMEM  scalar output bias
    # o_ref:    (TILE_B, 1)  VMEM  output tile
    x = x_ref[...]

    # Layer 1: MXU matmul with f32 accumulate, then bias-add + ReLU on the VPU.
    hidden = jnp.dot(x, w1_ref[...], preferred_element_type=jnp.float32)   # (TILE_B, H)
    hidden = jnp.maximum(hidden + b1w2_ref[0:1, :], 0.0)

    # Layer 2 (H -> 1): VPU multiply + XLU lane reduction instead of a second MXU matmul
    # (an N=1 matmul would use 1/256 of the MXU output width per pass).
    out = jnp.sum(hidden * b1w2_ref[1:2, :], axis=-1, keepdims=True)       # (TILE_B, 1)

    # Output block is (TILE_B, 1) (masked lane stores); output bytes are tiny relative to
    # the x-tile DMA, so a lane-dense relayout is not worth the extra transpose here.
    o_ref[...] = (out + b2_ref[0, 0]).astype(o_ref.dtype)


def _round_up(n, m):
    return ((n + m - 1) // m) * m


def _pick_tile_b(batch, in_features):
    # Keep the double-buffered x tile (2 * tile_b * D * 4 B) under ~16 MiB so the pipeline
    # stays deep even under v7x's 64 MiB physical / 32 MiB scoped VMEM.
    vmem_rows = max(8, (16 * 1024 * 1024) // (2 * in_features * 4))
    tile_b = min(1024, _round_up(batch, 8), vmem_rows)
    return max(8, (tile_b // 8) * 8)


def simple_nn_forward(x, w1, b1, w2, b2, *, tile_b=None):
    """Fused Linear -> ReLU -> Linear forward.

    x: [B, D] f32, w1: [D, H], b1: [1, H], w2: [H, 1], b2: [1, 1]. Returns [B, 1] f32.
    """
    batch, d = x.shape
    h = w1.shape[1]

    if tile_b is None:
        tile_b = _pick_tile_b(batch, d)
    tile_b = max(8, min((tile_b // 8) * 8, _round_up(batch, 8)))

    b_pad = _round_up(batch, tile_b)
    if b_pad != batch:
        x = jnp.pad(x, ((0, b_pad - batch), (0, 0)))

    # Pack the two tiny per-feature params into one VMEM-resident (2, H) array and push the
    # scalar output bias into SMEM -> fewer separate input DMAs.
    b1w2 = jnp.concatenate(
        [jnp.reshape(b1, (1, h)).astype(jnp.float32),
         jnp.reshape(w2, (1, h)).astype(jnp.float32)], axis=0)
    b2_smem = jnp.reshape(b2, (1, 1)).astype(jnp.float32)

    grid = (b_pad // tile_b,)
    cost = pl.CostEstimate(
        flops=2 * b_pad * d * h + 4 * b_pad * h + 2 * b_pad,
        transcendentals=0,
        bytes_accessed=4 * (b_pad * d + d * h + 2 * h + 1 + b_pad),
    )

    out = pl.pallas_call(
        simple_nn_kernel,
        out_shape=jax.ShapeDtypeStruct((b_pad, 1), jnp.float32),
        grid=grid,
        in_specs=[
            pl.BlockSpec((tile_b, d), lambda i: (i, 0)),         # x: one batch tile per step
            pl.BlockSpec((d, h), lambda i: (0, 0)),              # w1: VMEM-resident
            pl.BlockSpec((2, h), lambda i: (0, 0)),              # [b1; w2^T]: VMEM-resident
            pl.BlockSpec(memory_space=pltpu.MemorySpace.SMEM),   # b2 scalar in SMEM
        ],
        out_specs=pl.BlockSpec((tile_b, 1), lambda i: (i, 0)),
        compiler_params=pltpu.CompilerParams(
            dimension_semantics=("parallel",)),                  # v7x: 2 TCs share the grid
        cost_estimate=cost,
    )(x, w1, b1w2, b2_smem)

    return out[:batch]


def init_params(key, input_size):
    """Deterministic parameter init matching nn.Linear shapes
    (PyTorch-style uniform(-1/sqrt(fan_in), 1/sqrt(fan_in)))."""
    hidden_size = max(input_size // 2, 4)
    k1, k2, k3, k4 = jax.random.split(key, 4)
    bound1 = 1.0 / jnp.sqrt(jnp.float32(input_size))
    bound2 = 1.0 / jnp.sqrt(jnp.float32(hidden_size))
    # Stored transposed relative to PyTorch ([in, out]) so the kernel does x @ W.
    w1 = jax.random.uniform(k1, (input_size, hidden_size), jnp.float32, -bound1, bound1)
    b1 = jax.random.uniform(k2, (1, hidden_size), jnp.float32, -bound1, bound1)
    w2 = jax.random.uniform(k3, (hidden_size, 1), jnp.float32, -bound2, bound2)
    b2 = jax.random.uniform(k4, (1, 1), jnp.float32, -bound2, bound2)
    return w1, b1, w2, b2


if __name__ == "__main__":
    key = jax.random.PRNGKey(0)
    k_x, k_p = jax.random.split(key)

    batch = 512        # small, but enough rows to exercise a multi-step batch grid
    input_size = 32    # -> hidden_size = max(32 // 2, 4) = 16

    x = jax.random.normal(k_x, (batch, input_size), jnp.float32)
    w1, b1, w2, b2 = init_params(k_p, input_size)

    # Multi-step grid (4 steps of 128 rows).
    out = simple_nn_forward(x, w1, b1, w2, b2, tile_b=128)
    out = jax.block_until_ready(out)

    ref = jnp.maximum(x @ w1 + b1, 0.0) @ w2 + b2
    assert out.shape == (batch, 1)
    assert jnp.allclose(out, ref, atol=1e-5, rtol=1e-5), \
        float(jnp.max(jnp.abs(out - ref)))

    # Ragged batch (not a multiple of the tile) to exercise the pad/slice path.
    xr = x[:500]
    out_r = jax.block_until_ready(simple_nn_forward(xr, w1, b1, w2, b2, tile_b=128))
    ref_r = jnp.maximum(xr @ w1 + b1, 0.0) @ w2 + b2
    assert out_r.shape == (500, 1)
    assert jnp.allclose(out_r, ref_r, atol=1e-5, rtol=1e-5), \
        float(jnp.max(jnp.abs(out_r - ref_r)))

    print("KERNEL_OK")
</pallas_src>

<mosaic_0001>
module attributes {stable_mosaic.version = 11 : i64} {
  func.func @simple_nn_kernel(%arg0: i32, %arg1: memref<128x32xf32, #tpu.memory_space<vmem>>, %arg2: memref<32x16xf32, #tpu.memory_space<vmem>>, %arg3: memref<2x16xf32, #tpu.memory_space<vmem>>, %arg4: memref<1x1xf32, #tpu.memory_space<smem>>, %arg5: memref<128x1xf32, #tpu.memory_space<vmem>>) attributes {dimension_semantics = [#tpu.dimension_semantics<parallel>], iteration_bounds = array<i64: 4>, scalar_prefetch = 0 : i64, scratch_operands = 0 : i64, tpu.core_type = #tpu.core_type<tc>, window_params = [{transform_indices = @transform_0, window_bounds = array<i64: 128, 32>}, {pipeline_mode = #tpu.pipeline_mode<synchronous>, transform_indices = @transform_1, window_bounds = array<i64: 32, 16>}, {pipeline_mode = #tpu.pipeline_mode<synchronous>, transform_indices = @transform_2, window_bounds = array<i64: 2, 16>}, {transform_indices = @transform_3, window_bounds = array<i64: 1, 1>}, {transform_indices = @transform_4, window_bounds = array<i64: 128, 1>}]} {
    %c0 = arith.constant 0 : index
    %c0_0 = arith.constant 0 : index
    %0 = vector.load %arg1[%c0, %c0_0] : memref<128x32xf32, #tpu.memory_space<vmem>>, vector<128x32xf32>
    %c0_1 = arith.constant 0 : index
    %c0_2 = arith.constant 0 : index
    %1 = vector.load %arg2[%c0_1, %c0_2] : memref<32x16xf32, #tpu.memory_space<vmem>>, vector<32x16xf32>
    %cst = arith.constant dense<0.000000e+00> : vector<128x16xf32>
    %2 = tpu.matmul %0, %1, %cst {dimension_numbers = #tpu.dot_dimension_numbers<[1], [0], [0], [1], [0, 0, 1, 1], [], []>} : vector<128x32xf32>, vector<32x16xf32>, vector<128x16xf32> -> vector<128x16xf32>
    %c0_3 = arith.constant 0 : index
    %c0_4 = arith.constant 0 : index
    %3 = vector.load %arg3[%c0_3, %c0_4] : memref<2x16xf32, #tpu.memory_space<vmem>>, vector<1x16xf32>
    %4 = vector.broadcast %3 : vector<1x16xf32> to vector<128x16xf32>
    %5 = arith.addf %2, %4 : vector<128x16xf32>
    %cst_5 = arith.constant 0.000000e+00 : f32
    %6 = vector.broadcast %cst_5 : f32 to vector<128x16xf32>
    %7 = arith.maximumf %5, %6 : vector<128x16xf32>
    %c1 = arith.constant 1 : index
    %c0_6 = arith.constant 0 : index
    %8 = vector.load %arg3[%c1, %c0_6] : memref<2x16xf32, #tpu.memory_space<vmem>>, vector<1x16xf32>
    %9 = vector.broadcast %8 : vector<1x16xf32> to vector<128x16xf32>
    %10 = arith.mulf %7, %9 : vector<128x16xf32>
    %cst_7 = arith.constant dense<0.000000e+00> : vector<128xf32>
    %11 = vector.multi_reduction <add>, %10, %cst_7 [1] : vector<128x16xf32> to vector<128xf32>
    %12 = vector.shape_cast %11 : vector<128xf32> to vector<128x1xf32>
    %c0_8 = arith.constant 0 : index
    %c0_9 = arith.constant 0 : index
    %13 = memref.load %arg4[%c0_8, %c0_9] : memref<1x1xf32, #tpu.memory_space<smem>>
    %14 = vector.broadcast %13 : f32 to vector<128x1xf32>
    %15 = arith.addf %12, %14 : vector<128x1xf32>
    %c0_10 = arith.constant 0 : index
    %c0_11 = arith.constant 0 : index
    %16 = vector.load %arg5[%c0_10, %c0_11] : memref<128x1xf32, #tpu.memory_space<vmem>>, vector<128x1xf32>
    tpu.vector_store %arg5[%c0_10, %c0_11], %15 {strides = array<i32>} : memref<128x1xf32, #tpu.memory_space<vmem>>, vector<128x1xf32>,
    return
  }
  func.func @transform_0(%arg0: i32) -> (i32, i32) {
    %c0_i32 = arith.constant 0 : i32
    %c0_i32_0 = arith.constant 0 : i32
    return %arg0, %c0_i32 : i32, i32
  }
  func.func @transform_1(%arg0: i32) -> (i32, i32) {
    %c0_i32 = arith.constant 0 : i32
    %c0_i32_0 = arith.constant 0 : i32
    %c0_i32_1 = arith.constant 0 : i32
    return %c0_i32, %c0_i32_0 : i32, i32
  }
  func.func @transform_2(%arg0: i32) -> (i32, i32) {
    %c0_i32 = arith.constant 0 : i32
    %c0_i32_0 = arith.constant 0 : i32
    %c0_i32_1 = arith.constant 0 : i32
    return %c0_i32, %c0_i32_0 : i32, i32
  }
  func.func @transform_3(%arg0: i32) -> (i32, i32) {
    %c0_i32 = arith.constant 0 : i32
    %c0_i32_0 = arith.constant 0 : i32
    %c0_i32_1 = arith.constant 0 : i32
    return %c0_i32, %c0_i32_0 : i32, i32
  }
  func.func @transform_4(%arg0: i32) -> (i32, i32) {
    %c0_i32 = arith.constant 0 : i32
    %c0_i32_0 = arith.constant 0 : i32
    return %arg0, %c0_i32 : i32, i32
  }
}

</mosaic_0001>

<bundles_post_ra>
// kernel: tpu_custom_call.1
= control target key start
LH: loop header
LB: loop body
LE: loop exit
PB: predicated region body
PF: predicated region fallthrough
CT: control target
= control target key end

     0   :  { %s735_s17 = smov 0   ;;  %s897_s0 = inlined_call_operand.vmem [shape: f32[512,32], index: 0, kind: input, shape index: {}]   ;;  %s898_s1 = inlined_call_operand.vmem [shape: f32[32,16], index: 1, kind: input, shape index: {}]   ;;  %s899_s2 = inlined_call_operand.vmem [shape: f32[2,16], index: 2, kind: input, shape index: {}]   ;;  %s900_s3 = inlined_call_operand.<no memory space> [shape: f32[1,1], index: 3, kind: input, shape index: {}]   ;;  %s901_s4 = inlined_call_operand.vmem [shape: f32[512,1], index: 4, kind: output, shape index: {}]  }
   0x1   :  { %9 = sst [smem:[#allocation2]] %s900_s3 }
   0x2 LB: > { %s598_s18 = sadd.s32 4294967295, %s705_s17   ;;  %p602_p0 = scmp.ge.s32.totalorder %s705_s17, 1  ;;  %s705_s17 = sphi %s735_s17, %s15_s17  }
   0x3   : > { %p164_p1 = scmp.lt.s32.totalorder %s705_s17, 5 }
   0x5   : > { %p165_p2 = pnand %p602_p0, %p164_p1 }
   0x6   : > { %v218_v0 = vld [vmem:[%s898_s1] sm:$0xff] (!%p165_p2)  ;;  %v219_v1 = vld [vmem:[%s898_s1 + $0x8] sm:$0xff] (!%p165_p2)  ;;  %v220_v2 = vld [vmem:[%s898_s1 + $0x10] sm:$0xff] (!%p165_p2)  ;;  %s603_s24 = sshll.u32 (!%p165_p2), %s598_s18, 4  ;;  %vm227_vm0 = vcmask (!%p165_p2), 261120   ;;  %vm458_vm1 = vcmask (!%p165_p2), 130048  }
   0x7   : > { %168 = sbr.rel (%p165_p2) target bundleno = 412 (0x19c), region = 36  ;;  %v679_v3 = vpack.c.bf16 (!%p165_p2), %v219_v1, %v218_v0  ;;  %v221_v4 = vld [vmem:[%s898_s1 + $0x18] sm:$0xff] (!%p165_p2)  ;;  %p191_p3 = scmp.lt.s32.totalorder (!%p165_p2), %s603_s24, 63  ;;  %v800_v22 = vld [vmem:[%s899_s2] ss:$0 sm:$0xff] (!%p165_p2)  ;;  %vm525_vm2 = vcmask (!%p165_p2), 7168  }
   0x8   : > { %v683_v5 = vpack.c.bf16 (!%p165_p2), %v221_v4, %v220_v2  ;;  %v809_v31 = vld [vmem:[%s899_s2 + $0x1] ss:$0 sm:$0xff] (!%p165_p2)  ;;  %s507_s9 = sld [smem:[#allocation2]] (!%p165_p2) }
   0x9   : > { %680 = vmatprep.subr.bf16.mxu0 (!%p165_p2), %v679_v3  ;;  %687 = vmatprep.subr.bf16.mxu1 (!%p165_p2), %v679_v3 }
   0xa   : > { %682 = vmatpush3.bf16.msra.mxu0 (!%p165_p2), %v679_v3  ;;  %689 = vmatpush3.bf16.msra.mxu1 (!%p165_p2), %v679_v3 }
   0xb   : > { %684 = vmatprep.subr.bf16.mxu0 (!%p165_p2), %v683_v5  ;;  %688 = vmatprep.subr.bf16.mxu1 (!%p165_p2), %v683_v5 }
   0xe   : > { %s903_s24 = smov (!%p191_p3, %s603_s24), 63  ;;  %686 = vmatpush3.bf16.msra.mxu0 %v683_v5  ;;  %690 = vmatpush3.bf16.msra.mxu1 %v683_v5 }
   0xf   : > { %s604_s27 = sshll.u32 %s903_s24, 3 }
  0x10   : > { %s763_s30 = scalar_lea.vmem %s897_s0, %s604_s27  ;;  %s860_s12 = scalar_lea.vmem %s901_s4, %s604_s27 }
  0x11   : > { %v202_v6 = vld [vmem:[%s763_s30] sm:$0xff]  ;;  %v203_v8 = vld [vmem:[%s763_s30 + $0x8] sm:$0xff]  ;;  %v204_v10 = vld [vmem:[%s763_s30 + $0x10] sm:$0xff] }
  0x12   : > { %v210_v7 = vld [vmem:[%s763_s30 + $0x40] sm:$0xff]  ;;  %v211_v9 = vld [vmem:[%s763_s30 + $0x48] sm:$0xff]  ;;  %655 = vmatprep.mubr.msk.f32.mxu0 %vm227_vm0, %v202_v6  ;;  %v212_v11 = vld [vmem:[%s763_s30 + $0x50] sm:$0xff] }
  0x13   : > { %667 = vmatprep.mubr.msk.f32.mxu1 %vm227_vm0, %v210_v7  ;;  %656 = vmatmul.mubr.msk.f32.vlgmr.msra.gmra.mrb[0].mxu0 %vm227_vm0, %v203_v8  ;;  %v205_v12 = vld [vmem:[%s763_s30 + $0x18] sm:$0xff]  ;;  %v206_v14 = vld [vmem:[%s763_s30 + $0x20] sm:$0xff]  ;;  %v207_v16 = vld [vmem:[%s763_s30 + $0x28] sm:$0xff] }
  0x14   : > { %668 = vmatmul.mubr.msk.f32.vlgmr.msra.gmra.mrb[0].mxu1 %vm227_vm0, %v211_v9  ;;  %658 = vmatprep.mubr.msk.f32.mxu0 %vm227_vm0, %v204_v10  ;;  %v213_v13 = vld [vmem:[%s763_s30 + $0x58] sm:$0xff]  ;;  %v214_v15 = vld [vmem:[%s763_s30 + $0x60] sm:$0xff]  ;;  %v215_v17 = vld [vmem:[%s763_s30 + $0x68] sm:$0xff] }
  0x15   : > { %670 = vmatprep.mubr.msk.f32.mxu1 %vm227_vm0, %v212_v11  ;;  %v208_v18 = vld [vmem:[%s763_s30 + $0x30] sm:$0xff]  ;;  %v209_v20 = vld [vmem:[%s763_s30 + $0x38] sm:$0xff] }
  0x16   : > { %v216_v19 = vld [vmem:[%s763_s30 + $0x70] sm:$0xff]  ;;  %v217_v21 = vld [vmem:[%s763_s30 + $0x78] sm:$0xff] }
  0x17   : > { %659 = vmatmul.mubr.msk.f32.gmra.mrb[2].mxu0 %vm227_vm0, %v205_v12 }
  0x18   : > { %671 = vmatmul.mubr.msk.f32.gmra.mrb[2].mxu1 %vm227_vm0, %v213_v13  ;;  %661 = vmatprep.mubr.msk.f32.mxu0 %vm227_vm0, %v206_v14 }
  0x19   : > { %673 = vmatprep.mubr.msk.f32.mxu1 %vm227_vm0, %v214_v15 }
  0x1b   : > { %662 = vmatmul.mubr.msk.f32.gmra.mrb[4].mxu0 %vm227_vm0, %v207_v16 }
  0x1c   : > { %674 = vmatmul.mubr.msk.f32.gmra.mrb[4].mxu1 %vm227_vm0, %v215_v17  ;;  %664 = vmatprep.mubr.msk.f32.mxu0 %vm227_vm0, %v208_v18 }
  0x1d   : > { %676 = vmatprep.mubr.msk.f32.mxu1 %vm227_vm0, %v216_v19 }
  0x1f   : > { %665 = vmatmul.mubr.msk.f32.gmra.mrb[6].mxu0 %vm227_vm0, %v209_v20 }
  0x20   : > { %677 = vmatmul.mubr.msk.f32.gmra.mrb[6].mxu1 %vm227_vm0, %v217_v21 }
  0xe6   : > { %v657_v23 = vpop.f32.mrb[0].mxu0 }
  0xe7   : > { %v669_v24 = vpop.f32.mrb[0].mxu1  ;;  %v348_v25 = vadd.f32 %v657_v23, %v800_v22  ;;  %v342_v27 = vpop.f32.mrb[1].mxu0 }
  0xe8   : > { %v388_v26 = vadd.f32 %v669_v24, %v800_v22  ;;  %v382_v28 = vpop.f32.mrb[1].mxu1  ;;  %v343_v29 = vadd.f32 %v800_v22, %v342_v27 }
  0xe9   : > { %v383_v30 = vadd.f32 %v800_v22, %v382_v28  ;;  %v422_v32 = vmax.f32 %v348_v25, 0.0 }
  0xea   : > { %v430_v33 = vmax.f32 %v388_v26, 0.0  ;;  %v421_v34 = vmax.f32 %v343_v29, 0.0  ;;  %v660_v35 = vpop.f32.mrb[2].mxu0 }
  0xeb   : > { %v672_v36 = vpop.f32.mrb[2].mxu1  ;;  %v358_v37 = vadd.f32 %v660_v35, %v800_v22  ;;  %v352_v38 = vpop.f32.mrb[3].mxu0  ;;  %v443_v42 = vmul.f32 %v809_v31, %v422_v32  ;;  %v429_v43 = vmax.f32 %v383_v30, 0.0 }
  0xec   : > { %v398_v39 = vadd.f32 %v672_v36, %v800_v22  ;;  %v451_v40 = vmul.f32 %v809_v31, %v430_v33  ;;  %v392_v41 = vpop.f32.mrb[3].mxu1  ;;  %v353_v44 = vadd.f32 %v800_v22, %v352_v38  ;;  %v442_v46 = vmul.f32 %v809_v31, %v421_v34 }
  0xed   : > { %v393_v45 = vadd.f32 %v800_v22, %v392_v41  ;;  %v424_v47 = vmax.f32 %v358_v37, 0.0  ;;  %v462_v50 = vsel %vm458_vm1, %v443_v42, 0.0  ;;  %v450_v59 = vmul.f32 %v809_v31, %v429_v43 }
  0xee   : > { %v432_v48 = vmax.f32 %v398_v39, 0.0  ;;  %v486_v49 = vsel %vm458_vm1, %v451_v40, 0.0  ;;  %463 = vadd.xlane.f32.xlu0 %v462_v50  ;;  %v663_v51 = vpop.f32.mrb[4].mxu0  ;;  %v423_v60 = vmax.f32 %v353_v44, 0.0  ;;  %v459_v63 = vsel %vm458_vm1, %v442_v46, 0.0 }
  0xef   : > { %487 = vadd.xlane.f32.xlu1 %v486_v49  ;;  %v675_v52 = vpop.f32.mrb[4].mxu1  ;;  %v445_v53 = vmul.f32 %v809_v31, %v424_v47  ;;  %v368_v54 = vadd.f32 %v663_v51, %v800_v22  ;;  %v362_v55 = vpop.f32.mrb[5].mxu0  ;;  %v431_v61 = vmax.f32 %v393_v45, 0.0  ;;  %v483_v9 = vsel %vm458_vm1, %v450_v59, 0.0 }
  0xf0   : > { %v453_v56 = vmul.f32 %v809_v31, %v432_v48  ;;  %v402_v57 = vpop.f32.mrb[5].mxu1  ;;  %v363_v58 = vadd.f32 %v800_v22, %v362_v55  ;;  %v408_v0 = vadd.f32 %v675_v52, %v800_v22  ;;  %v444_v10 = vmul.f32 %v809_v31, %v423_v60 }
  0xf1   : > { %v468_v62 = vsel %vm458_vm1, %v445_v53, 0.0  ;;  %v403_v1 = vadd.f32 %v800_v22, %v402_v57  ;;  %v426_v4 = vmax.f32 %v368_v54, 0.0  ;;  %v452_v11 = vmul.f32 %v809_v31, %v431_v61 }
  0xf2   : > { %460 = vadd.xlane.f32.xlu0 %v459_v63  ;;  %v666_v2 = vpop.f32.mrb[6].mxu0  ;;  %v425_v5 = vmax.f32 %v363_v58, 0.0  ;;  %v492_v6 = vsel %vm458_vm1, %v453_v56, 0.0  ;;  %v434_v12 = vmax.f32 %v408_v0, 0.0  ;;  %v465_v18 = vsel %vm458_vm1, %v444_v10, 0.0 }
  0xf3   : > { %469 = vadd.xlane.f32.xlu1 %v468_v62  ;;  %v678_v3 = vpop.f32.mrb[6].mxu1  ;;  %v372_v7 = vpop.f32.mrb[7].mxu0  ;;  %v433_v13 = vmax.f32 %v403_v1, 0.0  ;;  %v378_v14 = vadd.f32 %v666_v2, %v800_v22  ;;  %v447_v16 = vmul.f32 %v809_v31, %v426_v4  ;;  %v489_v19 = vsel %vm458_vm1, %v452_v11, 0.0 }
  0xf4   : > { %v412_v8 = vpop.f32.mrb[7].mxu1  ;;  %v373_v15 = vadd.f32 %v800_v22, %v372_v7  ;;  %v446_v17 = vmul.f32 %v809_v31, %v425_v5  ;;  %v418_v20 = vadd.f32 %v678_v3, %v800_v22  ;;  %v455_v23 = vmul.f32 %v809_v31, %v434_v12 }
  0xf5   : > { %v413_v21 = vadd.f32 %v800_v22, %v412_v8  ;;  %v454_v24 = vmul.f32 %v809_v31, %v433_v13  ;;  %v428_v25 = vmax.f32 %v378_v14, 0.0  ;;  %v474_v27 = vsel %vm458_vm1, %v447_v16, 0.0 }
  0xf6   : > { %484 = vadd.xlane.f32.xlu0 %v483_v9  ;;  %v427_v26 = vmax.f32 %v373_v15, 0.0  ;;  %v471_v28 = vsel %vm458_vm1, %v446_v17, 0.0  ;;  %v436_v29 = vmax.f32 %v418_v20, 0.0  ;;  %v498_v30 = vsel %vm458_vm1, %v455_v23, 0.0 }
  0xf7   : > { %493 = vadd.xlane.f32.xlu1 %v492_v6  ;;  %v435_v32 = vmax.f32 %v413_v21, 0.0  ;;  %v495_v33 = vsel %vm458_vm1, %v454_v24, 0.0  ;;  %v449_v22 = vmul.f32 %v809_v31, %v428_v25  ;;  %v508_v41 = vstv %s507_s9 }
  0xf8   : > { %v448_v34 = vmul.f32 %v809_v31, %v427_v26  ;;  %v457_v37 = vmul.f32 %v809_v31, %v436_v29 }
  0xf9   : > { %v480_v35 = vsel %vm458_vm1, %v449_v22, 0.0  ;;  %v456_v38 = vmul.f32 %v809_v31, %v435_v32 }
  0xfa   : > { %490 = vadd.xlane.f32.xlu0 %v489_v19  ;;  %v477_v36 = vsel %vm458_vm1, %v448_v34, 0.0  ;;  %v504_v39 = vsel %vm458_vm1, %v457_v37, 0.0 }
  0xfb   : > { %466 = vadd.xlane.f32.xlu1 %v465_v18  ;;  %v501_v40 = vsel %vm458_vm1, %v456_v38, 0.0 }
  0xfe   : > { %472 = vadd.xlane.f32.xlu0 %v471_v28 }
  0xff   : > { %475 = vadd.xlane.f32.xlu1 %v474_v27 }
 0x102   : > { %496 = vadd.xlane.f32.xlu0 %v495_v33 }
 0x103   : > { %499 = vadd.xlane.f32.xlu1 %v498_v30 }
 0x106   : > { %478 = vadd.xlane.f32.xlu0 %v477_v36 }
 0x107   : > { %481 = vadd.xlane.f32.xlu1 %v480_v35 }
 0x10a   : > { %502 = vadd.xlane.f32.xlu0 %v501_v40 }
 0x10b   : > { %505 = vadd.xlane.f32.xlu1 %v504_v39 }
 0x17b   : > { %v464_v42 = vpop.xlane.xlu0 %463 }
 0x17c   : > { %v488_v31 = vpop.xlane.xlu1 %487  ;;  %v510_v44 = vadd.f32 %v508_v41, %v464_v42 }
 0x17d   : > { %v518_v43 = vadd.f32 %v508_v41, %v488_v31 }
 0x17e   : > { %527 = vst.msk [vmem:[%s860_s12 + $0x8] sm:$0xff] %vm525_vm2, %v510_v44 }
 0x17f   : > { %535 = vst.msk [vmem:[%s860_s12 + $0x48] sm:$0xff] %vm525_vm2, %v518_v43  ;;  %v461_v46 = vpop.xlane.xlu0 %460 }
 0x180   : > { %v470_v45 = vpop.xlane.xlu1 %469  ;;  %v509_v48 = vadd.f32 %v508_v41, %v461_v46 }
 0x181   : > { %v512_v47 = vadd.f32 %v508_v41, %v470_v45 }
 0x182   : > { %526 = vst.msk [vmem:[%s860_s12] sm:$0xff] %vm525_vm2, %v509_v48 }
 0x183   : > { %529 = vst.msk [vmem:[%s860_s12 + $0x18] sm:$0xff] %vm525_vm2, %v512_v47  ;;  %v485_v50 = vpop.xlane.xlu0 %484 }
 0x184   : > { %v494_v49 = vpop.xlane.xlu1 %493  ;;  %v517_v52 = vadd.f32 %v508_v41, %v485_v50 }
 0x185   : > { %v520_v51 = vadd.f32 %v508_v41, %v494_v49 }
 0x186   : > { %534 = vst.msk [vmem:[%s860_s12 + $0x40] sm:$0xff] %vm525_vm2, %v517_v52 }
 0x187   : > { %537 = vst.msk [vmem:[%s860_s12 + $0x58] sm:$0xff] %vm525_vm2, %v520_v51  ;;  %v491_v54 = vpop.xlane.xlu0 %490 }
 0x188   : > { %v467_v53 = vpop.xlane.xlu1 %466  ;;  %v519_v56 = vadd.f32 %v508_v41, %v491_v54 }
 0x189   : > { %v511_v55 = vadd.f32 %v508_v41, %v467_v53 }
 0x18a   : > { %536 = vst.msk [vmem:[%s860_s12 + $0x50] sm:$0xff] %vm525_vm2, %v519_v56 }
 0x18b   : > { %528 = vst.msk [vmem:[%s860_s12 + $0x10] sm:$0xff] %vm525_vm2, %v511_v55  ;;  %v473_v58 = vpop.xlane.xlu0 %472 }
 0x18c   : > { %v476_v57 = vpop.xlane.xlu1 %475  ;;  %v513_v60 = vadd.f32 %v508_v41, %v473_v58 }
 0x18d   : > { %v514_v59 = vadd.f32 %v508_v41, %v476_v57 }
 0x18e   : > { %530 = vst.msk [vmem:[%s860_s12 + $0x20] sm:$0xff] %vm525_vm2, %v513_v60 }
 0x18f   : > { %531 = vst.msk [vmem:[%s860_s12 + $0x28] sm:$0xff] %vm525_vm2, %v514_v59  ;;  %v497_v62 = vpop.xlane.xlu0 %496 }
 0x190   : > { %v500_v61 = vpop.xlane.xlu1 %499  ;;  %v521_v0 = vadd.f32 %v508_v41, %v497_v62 }
 0x191   : > { %v522_v63 = vadd.f32 %v508_v41, %v500_v61 }
 0x192   : > { %538 = vst.msk [vmem:[%s860_s12 + $0x60] sm:$0xff] %vm525_vm2, %v521_v0 }
 0x193   : > { %539 = vst.msk [vmem:[%s860_s12 + $0x68] sm:$0xff] %vm525_vm2, %v522_v63  ;;  %v479_v2 = vpop.xlane.xlu0 %478 }
 0x194   : > { %v482_v1 = vpop.xlane.xlu1 %481  ;;  %v515_v4 = vadd.f32 %v508_v41, %v479_v2 }
 0x195   : > { %v516_v3 = vadd.f32 %v508_v41, %v482_v1 }
 0x196   : > { %532 = vst.msk [vmem:[%s860_s12 + $0x30] sm:$0xff] %vm525_vm2, %v515_v4 }
 0x197   : > { %533 = vst.msk [vmem:[%s860_s12 + $0x38] sm:$0xff] %vm525_vm2, %v516_v3  ;;  %v503_v6 = vpop.xlane.xlu0 %502 }
 0x198   : > { %v506_v5 = vpop.xlane.xlu1 %505  ;;  %v523_v8 = vadd.f32 %v508_v41, %v503_v6 }
 0x199   : > { %v524_v7 = vadd.f32 %v508_v41, %v506_v5 }
 0x19a   : > { %540 = vst.msk [vmem:[%s860_s12 + $0x70] sm:$0xff] %vm525_vm2, %v523_v8 }
 0x19b   : > { %541 = vst.msk [vmem:[%s860_s12 + $0x78] sm:$0xff] %vm525_vm2, %v524_v7 }
 0x19c PF: > { %s15_s17 = sadd.s32 1, %s705_s17  }
 0x19d   : > { %p12_p4 = scmp.ge.s32.totalorder %s15_s17, 6  }
 0x19f   :  { %14 = sbr.rel (!%p12_p4) target bundleno = 2 (0x2), region = 66 }

</bundles_post_ra>
